<compile_context>
chip_gen: v7x
topology: tpu7x:2x2x1
jax: 0.10.0
libtpu: 0.0.40
codegen_flags: <defaults>
</compile_context>

<pallas_src>
import functools

import jax
import jax.numpy as jnp
from jax.experimental import pallas as pl
from jax.experimental.pallas import tpu as pltpu


_N_CORE_SPLIT = 2  # v7x: 2 TensorCores per chip. On v5e/v6e this is just 2 sequential chunks.


def _capsule_loss_kernel(labels_ref, classes_ref, images_ref, recon_ref,
                         out_ref, acc_ref, *, batch, row_tile, inner_steps,
                         needs_mask):
    core = pl.program_id(0)   # "parallel" axis (megacore split on v7x)
    step = pl.program_id(1)   # "arbitrary" reduction axis over row tiles

    @pl.when(step == 0)
    def _init():
        acc_ref[...] = jnp.zeros_like(acc_ref)

    # Streamed squared-error accumulation (native dtype in HBM, f32 in-kernel).
    diff = recon_ref[...].astype(jnp.float32) - images_ref[...].astype(jnp.float32)
    sq = diff * diff
    if needs_mask:
        row0 = (core * inner_steps + step) * row_tile
        rows = jax.lax.broadcasted_iota(jnp.int32, (row_tile, 1), 0) + row0
        sq = jnp.where(rows < batch, sq, 0.0)
    acc_ref[...] += sq  # per-vreg partial sums; pure VPU in the inner loop

    @pl.when(step == inner_steps - 1)
    def _finalize():
        # One cross-lane/sublane reduction per core.
        recon_sum = jnp.sum(acc_ref[...])

        # Margin loss on the tiny resident (B, K) blocks; counted exactly once
        # (core 0 only), and only at this finalize step.
        classes = classes_ref[...].astype(jnp.float32)
        labels = labels_ref[...].astype(jnp.float32)
        left = jnp.maximum(0.9 - classes, 0.0)
        right = jnp.maximum(classes - 0.1, 0.0)
        margin = jnp.sum(labels * (left * left)
                         + 0.5 * (1.0 - labels) * (right * right))
        margin = jnp.where(core == 0, margin, 0.0)

        partial = (margin + 0.0005 * recon_sum) / float(batch)
        out_ref[...] = jnp.full(out_ref.shape, partial, dtype=out_ref.dtype)


def _choose_row_tile(batch, d, itemsize):
    # 2 streamed inputs x 2 pipeline buffers (native dtype) + 1 f32 accumulator,
    # kept under ~10 MiB so we stay inside even v5e's 16 MiB scoped-VMEM default
    # (and far under v7x's 64 MiB physical VMEM).
    budget = 10 * 1024 * 1024
    per_row = d * (4 * itemsize + 4)
    tb = max(8, min(1024, budget // per_row))
    tb = max(8, (tb // 8) * 8)
    if batch <= tb:
        return batch  # single full-extent row block (no (8,) divisibility needed)
    return int(tb)


def capsule_loss(images, labels, classes, reconstructions, row_tile=None):
    """images: (B, C, H, W); labels, classes: (B, K); reconstructions: (B, C*H*W)."""
    assert images.size == reconstructions.size
    batch, d = reconstructions.shape
    k = classes.shape[-1]
    # Row-major flatten matches torch .view; keep the native dtype (no f32 copy).
    images_flat = images.reshape(batch, d)

    itemsize = max(images.dtype.itemsize, reconstructions.dtype.itemsize)
    if row_tile is None:
        tb = _choose_row_tile(batch, d, itemsize)
    else:
        tb = batch if batch <= row_tile else int(row_tile)
    assert tb == batch or tb % 8 == 0, "row tile must be a multiple of 8 or the full batch"

    n_blocks = pl.cdiv(batch, tb)
    inner = pl.cdiv(n_blocks, _N_CORE_SPLIT)
    needs_mask = (_N_CORE_SPLIT * inner * tb) != batch

    def row_map(c, i):
        # Clamp so a fully out-of-range step just re-reads the last real block;
        # its (logical) rows are masked out of the sum inside the kernel.
        return (jnp.minimum(c * inner + i, n_blocks - 1), 0)

    kernel = functools.partial(
        _capsule_loss_kernel,
        batch=batch, row_tile=tb, inner_steps=inner, needs_mask=needs_mask)

    partials = pl.pallas_call(
        kernel,
        out_shape=jax.ShapeDtypeStruct((_N_CORE_SPLIT, 1, 128), jnp.float32),
        grid=(_N_CORE_SPLIT, inner),
        in_specs=[
            pl.BlockSpec((batch, k), lambda c, i: (0, 0)),  # labels (tiny, resident)
            pl.BlockSpec((batch, k), lambda c, i: (0, 0)),  # classes (tiny, resident)
            pl.BlockSpec((tb, d), row_map),                 # images (streamed)
            pl.BlockSpec((tb, d), row_map),                 # reconstructions (streamed)
        ],
        out_specs=pl.BlockSpec((1, 1, 128), lambda c, i: (c, 0, 0)),
        scratch_shapes=[pltpu.VMEM((tb, d), jnp.float32)],
        compiler_params=pltpu.CompilerParams(
            dimension_semantics=("parallel", "arbitrary")),
    )(labels, classes, images_flat, reconstructions)

    # Each per-core partial is already margin-gated and divided by batch.
    return jnp.sum(partials[:, 0, 0])


def _reference(images, labels, classes, reconstructions):
    classes = classes.astype(jnp.float32)
    labels = labels.astype(jnp.float32)
    left = jnp.maximum(0.9 - classes, 0.0) ** 2
    right = jnp.maximum(classes - 0.1, 0.0) ** 2
    margin = jnp.sum(labels * left + 0.5 * (1.0 - labels) * right)
    imgs = images.reshape(reconstructions.shape[0], -1).astype(jnp.float32)
    recon = jnp.sum((reconstructions.astype(jnp.float32) - imgs) ** 2)
    return (margin + 0.0005 * recon) / images.shape[0]


if __name__ == "__main__":
    key = jax.random.PRNGKey(0)
    k1, k2, k3, k4 = jax.random.split(key, 4)

    B, C, H, W = 2, 4, 16, 16
    NUM_CLASSES = 10
    D = C * H * W

    images = jax.random.normal(k1, (B, C, H, W), dtype=jnp.float32)
    label_idx = jax.random.randint(k2, (B,), 0, NUM_CLASSES)
    labels = jax.nn.one_hot(label_idx, NUM_CLASSES, dtype=jnp.float32)
    classes = jax.nn.sigmoid(jax.random.normal(k3, (B, NUM_CLASSES), dtype=jnp.float32))
    reconstructions = jax.random.normal(k4, (B, D), dtype=jnp.float32)

    loss = jax.block_until_ready(capsule_loss(images, labels, classes, reconstructions))
    ref = _reference(images, labels, classes, reconstructions)
    assert jnp.allclose(loss, ref, rtol=1e-5, atol=1e-5), (loss, ref)

    # Second check: exercise the streamed multi-tile path with a masked tail
    # (batch not divisible by the row tile, odd number of row blocks).
    B2 = 24
    images2 = jax.random.normal(k1, (B2, C, H, W), dtype=jnp.float32)
    label_idx2 = jax.random.randint(k2, (B2,), 0, NUM_CLASSES)
    labels2 = jax.nn.one_hot(label_idx2, NUM_CLASSES, dtype=jnp.float32)
    classes2 = jax.nn.sigmoid(jax.random.normal(k3, (B2, NUM_CLASSES), dtype=jnp.float32))
    recon2 = jax.random.normal(k4, (B2, D), dtype=jnp.float32)

    loss2 = jax.block_until_ready(
        capsule_loss(images2, labels2, classes2, recon2, row_tile=8))
    ref2 = _reference(images2, labels2, classes2, recon2)
    assert jnp.allclose(loss2, ref2, rtol=1e-5, atol=1e-5), (loss2, ref2)

    print("KERNEL_OK")
</pallas_src>

<mosaic_0001>
module attributes {stable_mosaic.version = 11 : i64} {
  func.func @_capsule_loss_kernel(%arg0: i32, %arg1: i32, %arg2: memref<2x10xf32, #tpu.memory_space<vmem>>, %arg3: memref<2x10xf32, #tpu.memory_space<vmem>>, %arg4: memref<2x1024xf32, #tpu.memory_space<vmem>>, %arg5: memref<2x1024xf32, #tpu.memory_space<vmem>>, %arg6: memref<1x1x128xf32, #tpu.memory_space<vmem>>, %arg7: memref<2x1024xf32, #tpu.memory_space<vmem>>) attributes {dimension_semantics = [#tpu.dimension_semantics<parallel>, #tpu.dimension_semantics<arbitrary>], iteration_bounds = array<i64: 2, 1>, scalar_prefetch = 0 : i64, scratch_operands = 1 : i64, tpu.core_type = #tpu.core_type<tc>, window_params = [{pipeline_mode = #tpu.pipeline_mode<synchronous>, transform_indices = @transform_0, window_bounds = array<i64: 2, 10>}, {pipeline_mode = #tpu.pipeline_mode<synchronous>, transform_indices = @transform_1, window_bounds = array<i64: 2, 10>}, {transform_indices = @transform_2, window_bounds = array<i64: 2, 1024>}, {transform_indices = @transform_3, window_bounds = array<i64: 2, 1024>}, {transform_indices = @transform_4, window_bounds = array<i64: 1, 1, 128>}]} {
    %c0_i32 = arith.constant 0 : i32
    %0 = arith.cmpi eq, %arg1, %c0_i32 : i32
    %1 = arith.extui %0 : i1 to i32
    %c0_i32_0 = arith.constant 0 : i32
    %2 = arith.cmpi ne, %1, %c0_i32_0 : i32
    scf.if %2 {
      %cst_11 = arith.constant 0.000000e+00 : f32
      %25 = vector.broadcast %cst_11 : f32 to vector<2x1024xf32>
      %c0_12 = arith.constant 0 : index
      %c0_13 = arith.constant 0 : index
      %26 = vector.load %arg7[%c0_12, %c0_13] : memref<2x1024xf32, #tpu.memory_space<vmem>>, vector<2x1024xf32>
      tpu.vector_store %arg7[%c0_12, %c0_13], %25 {strides = array<i32>} : memref<2x1024xf32, #tpu.memory_space<vmem>>, vector<2x1024xf32>,
    } else {
    }
    %c0 = arith.constant 0 : index
    %c0_1 = arith.constant 0 : index
    %3 = vector.load %arg5[%c0, %c0_1] : memref<2x1024xf32, #tpu.memory_space<vmem>>, vector<2x1024xf32>
    %c0_2 = arith.constant 0 : index
    %c0_3 = arith.constant 0 : index
    %4 = vector.load %arg4[%c0_2, %c0_3] : memref<2x1024xf32, #tpu.memory_space<vmem>>, vector<2x1024xf32>
    %5 = arith.subf %3, %4 : vector<2x1024xf32>
    %6 = arith.mulf %5, %5 : vector<2x1024xf32>
    %c1_i32 = arith.constant 1 : i32
    %7 = arith.muli %arg0, %c1_i32 : i32
    %8 = arith.addi %7, %arg1 : i32
    %c2_i32 = arith.constant 2 : i32
    %9 = arith.muli %8, %c2_i32 : i32
    %10 = tpu.iota {dimensions = array<i32: 0>} : vector<2x1xi32>
    %11 = vector.broadcast %9 : i32 to vector<2x1xi32>
    %12 = arith.addi %10, %11 : vector<2x1xi32>
    %c2_i32_4 = arith.constant 2 : i32
    %13 = vector.broadcast %c2_i32_4 : i32 to vector<2x1xi32>
    %14 = arith.cmpi slt, %12, %13 : vector<2x1xi32>
    %cst = arith.constant 0.000000e+00 : f32
    %15 = vector.shape_cast %14 : vector<2x1xi1> to vector<2x1xi1>
    %16 = vector.broadcast %15 : vector<2x1xi1> to vector<2x1024xi1>
    %17 = vector.broadcast %cst : f32 to vector<2x1024xf32>
    %18 = arith.select %16, %6, %17 : vector<2x1024xi1>, vector<2x1024xf32>
    %c0_5 = arith.constant 0 : index
    %c0_6 = arith.constant 0 : index
    %19 = vector.load %arg7[%c0_5, %c0_6] : memref<2x1024xf32, #tpu.memory_space<vmem>>, vector<2x1024xf32>
    %20 = arith.addf %19, %18 : vector<2x1024xf32>
    %c0_7 = arith.constant 0 : index
    %c0_8 = arith.constant 0 : index
    %21 = vector.load %arg7[%c0_7, %c0_8] : memref<2x1024xf32, #tpu.memory_space<vmem>>, vector<2x1024xf32>
    tpu.vector_store %arg7[%c0_7, %c0_8], %20 {strides = array<i32>} : memref<2x1024xf32, #tpu.memory_space<vmem>>, vector<2x1024xf32>,
    %c0_i32_9 = arith.constant 0 : i32
    %22 = arith.cmpi eq, %arg1, %c0_i32_9 : i32
    %23 = arith.extui %22 : i1 to i32
    %c0_i32_10 = arith.constant 0 : i32
    %24 = arith.cmpi ne, %23, %c0_i32_10 : i32
    scf.if %24 {
      %c0_11 = arith.constant 0 : index
      %c0_12 = arith.constant 0 : index
      %25 = vector.load %arg7[%c0_11, %c0_12] : memref<2x1024xf32, #tpu.memory_space<vmem>>, vector<2x1024xf32>
      %26 = vector.shape_cast %25 : vector<2x1024xf32> to vector<1x2x1024xf32>
      %cst_13 = arith.constant dense<0.000000e+00> : vector<1xf32>
      %27 = vector.multi_reduction <add>, %26, %cst_13 [1, 2] : vector<1x2x1024xf32> to vector<1xf32>
      %28 = vector.shape_cast %27 : vector<1xf32> to vector<1x1x1xf32>
      %29 = vector.extract %28[0, 0, 0] : f32 from vector<1x1x1xf32>
      %c0_14 = arith.constant 0 : index
      %c0_15 = arith.constant 0 : index
      %30 = vector.load %arg3[%c0_14, %c0_15] : memref<2x10xf32, #tpu.memory_space<vmem>>, vector<2x10xf32>
      %c0_16 = arith.constant 0 : index
      %c0_17 = arith.constant 0 : index
      %31 = vector.load %arg2[%c0_16, %c0_17] : memref<2x10xf32, #tpu.memory_space<vmem>>, vector<2x10xf32>
      %cst_18 = arith.constant 0.899999976 : f32
      %32 = vector.broadcast %cst_18 : f32 to vector<2x10xf32>
      %33 = arith.subf %32, %30 : vector<2x10xf32>
      %cst_19 = arith.constant 0.000000e+00 : f32
      %34 = vector.broadcast %cst_19 : f32 to vector<2x10xf32>
      %35 = arith.maximumf %33, %34 : vector<2x10xf32>
      %cst_20 = arith.constant 1.000000e-01 : f32
      %36 = vector.broadcast %cst_20 : f32 to vector<2x10xf32>
      %37 = arith.subf %30, %36 : vector<2x10xf32>
      %cst_21 = arith.constant 0.000000e+00 : f32
      %38 = vector.broadcast %cst_21 : f32 to vector<2x10xf32>
      %39 = arith.maximumf %37, %38 : vector<2x10xf32>
      %40 = arith.mulf %35, %35 : vector<2x10xf32>
      %41 = arith.mulf %31, %40 : vector<2x10xf32>
      %cst_22 = arith.constant 1.000000e+00 : f32
      %42 = vector.broadcast %cst_22 : f32 to vector<2x10xf32>
      %43 = arith.subf %42, %31 : vector<2x10xf32>
      %cst_23 = arith.constant 5.000000e-01 : f32
      %44 = vector.broadcast %cst_23 : f32 to vector<2x10xf32>
      %45 = arith.mulf %44, %43 : vector<2x10xf32>
      %46 = arith.mulf %39, %39 : vector<2x10xf32>
      %47 = arith.mulf %45, %46 : vector<2x10xf32>
      %48 = arith.addf %41, %47 : vector<2x10xf32>
      %49 = vector.shape_cast %48 : vector<2x10xf32> to vector<1x2x10xf32>
      %cst_24 = arith.constant dense<0.000000e+00> : vector<1xf32>
      %50 = vector.multi_reduction <add>, %49, %cst_24 [1, 2] : vector<1x2x10xf32> to vector<1xf32>
      %51 = vector.shape_cast %50 : vector<1xf32> to vector<1x1x1xf32>
      %52 = vector.extract %51[0, 0, 0] : f32 from vector<1x1x1xf32>
      %c0_i32_25 = arith.constant 0 : i32
      %53 = arith.cmpi eq, %arg0, %c0_i32_25 : i32
      %cst_26 = arith.constant 0.000000e+00 : f32
      %54 = arith.select %53, %52, %cst_26 : f32
      %cst_27 = arith.constant 5.000000e-04 : f32
      %55 = arith.mulf %cst_27, %29 : f32
      %56 = arith.addf %54, %55 : f32
      %cst_28 = arith.constant 2.000000e+00 : f32
      %57 = arith.divf %56, %cst_28 : f32
      %58 = vector.broadcast %57 : f32 to vector<1x1x128xf32>
      %c0_29 = arith.constant 0 : index
      %c0_30 = arith.constant 0 : index
      %c0_31 = arith.constant 0 : index
      %59 = vector.load %arg6[%c0_29, %c0_30, %c0_31] : memref<1x1x128xf32, #tpu.memory_space<vmem>>, vector<1x1x128xf32>
      tpu.vector_store %arg6[%c0_29, %c0_30, %c0_31], %58 {strides = array<i32>} : memref<1x1x128xf32, #tpu.memory_space<vmem>>, vector<1x1x128xf32>,
    } else {
    }
    return
  }
  func.func @transform_0(%arg0: i32, %arg1: i32) -> (i32, i32) {
    %c0_i32 = arith.constant 0 : i32
    %c0_i32_0 = arith.constant 0 : i32
    %c0_i32_1 = arith.constant 0 : i32
    return %c0_i32, %c0_i32_0 : i32, i32
  }
  func.func @transform_1(%arg0: i32, %arg1: i32) -> (i32, i32) {
    %c0_i32 = arith.constant 0 : i32
    %c0_i32_0 = arith.constant 0 : i32
    %c0_i32_1 = arith.constant 0 : i32
    return %c0_i32, %c0_i32_0 : i32, i32
  }
  func.func @transform_2(%arg0: i32, %arg1: i32) -> (i32, i32) {
    %c1_i32 = arith.constant 1 : i32
    %0 = arith.muli %arg0, %c1_i32 : i32
    %1 = arith.addi %0, %arg1 : i32
    %c0_i32 = arith.constant 0 : i32
    %2 = arith.minsi %1, %c0_i32 : i32
    %c0_i32_0 = arith.constant 0 : i32
    %c0_i32_1 = arith.constant 0 : i32
    return %2, %c0_i32_0 : i32, i32
  }
  func.func @transform_3(%arg0: i32, %arg1: i32) -> (i32, i32) {
    %c1_i32 = arith.constant 1 : i32
    %0 = arith.muli %arg0, %c1_i32 : i32
    %1 = arith.addi %0, %arg1 : i32
    %c0_i32 = arith.constant 0 : i32
    %2 = arith.minsi %1, %c0_i32 : i32
    %c0_i32_0 = arith.constant 0 : i32
    %c0_i32_1 = arith.constant 0 : i32
    return %2, %c0_i32_0 : i32, i32
  }
  func.func @transform_4(%arg0: i32, %arg1: i32) -> (i32, i32, i32) {
    %c0_i32 = arith.constant 0 : i32
    %c0_i32_0 = arith.constant 0 : i32
    %c0_i32_1 = arith.constant 0 : i32
    return %arg0, %c0_i32, %c0_i32_0 : i32, i32, i32
  }
}

</mosaic_0001>

<bundles_post_ra>
// kernel: tpu_custom_call.1
= control target key start
LH: loop header
LB: loop body
LE: loop exit
PB: predicated region body
PF: predicated region fallthrough
CT: control target
= control target key end

     0   :  { %s1270_s0 = inlined_call_operand.hbm [shape: f32[2,10], index: 0, kind: input, shape index: {}]   ;;  %s1271_s1 = inlined_call_operand.vmem [shape: f32[2,10], index: 1, kind: input, shape index: {}]   ;;  %s1272_s2 = inlined_call_operand.hbm [shape: f32[2,1024], index: 2, kind: input, shape index: {}]   ;;  %s1273_s3 = inlined_call_operand.hbm [shape: f32[2,1024], index: 3, kind: input, shape index: {}]   ;;  %s1274_s4 = inlined_call_operand.hbm [shape: f32[2,1,128], index: 4, kind: output, shape index: {}]  }
   0x1   :  { %1281 = sst [smem:[#allocation14_spill]] %s1272_s2 }
   0x2   :  { %9 = vsyncpa [#allocation4], 0 }
   0x3   :  { %10 = vsyncpa [#allocation7], 0 }
   0x4   :  { %12 = vsyncpa [#allocation7 + $0x1], 0 }
   0x5   :  { %13 = vsyncpa [#allocation5], 0 }
   0x6   :  { %15 = vsyncpa [#allocation5 + $0x1], 0  ;;  %s1006_s15 = smov 0   ;;  %s1008_s16 = smov 0  }
   0x7   :  { %s1010_s17 = smov 0   ;;  %s1012_s18 = smov 0  }
   0x8   :  { %s1014_s19 = smov 0   ;;  %s1016_s20 = smov 0  }
   0x9   :  { %s1018_s21 = smov 0   ;;  %s1020_s22 = smov 0  }
   0xa LB: > { %s33_s23 = sadd.s32 1, %s970_s21  ;;  %p943_p1 = scmp.ne.s32.totalorder %s962_s19, 0  ;;  %s974_s22 = sphi %s1020_s22, %s21_s22   ;;  %s970_s21 = sphi %s1018_s21, %s1306_s21   ;;  %s966_s20 = sphi %s1016_s20, %s1305_s20   ;;  %s962_s19 = sphi %s1014_s19, %s1260_s19   ;;  %s958_s18 = sphi %s1012_s18, %s1304_s18   ;;  %s954_s17 = sphi %s1010_s17, %s1303_s17   ;;  %s950_s16 = sphi %s1008_s16, %s1302_s16   ;;  %s946_s15 = sphi %s1006_s15, %s1301_s15  }
   0xb   : > { %p35_p0 = scmp.ge.s32.totalorder %s33_s23, 2  ;;  %p96_p2 = scmp.eq.s32.totalorder %s974_s22, 0 }
   0xc   : > { %p702_p5 = scmp.lt.s32.totalorder %s974_s22, 2  ;;  %s197_s25 = sand.u32 1, %s974_s22  }
   0xd   : > { %s1308_s23 = smov (%p35_p0, %s33_s23), 0  ;;  %p97_p3 = por %p943_p1, %p96_p2 }
   0xe   : > { %1282 = sst [smem:[#allocation13_spill]] %s1308_s23  ;;  %s143_s24 = ssub.s32 %s970_s21, %s1308_s23 }
   0xf   : > { %p1056_p6 = pnand %p702_p5, %p97_p3  ;;  %p1060_p7 = scmp.eq.s32.totalorder %s143_s24, 0 }
  0x10   : > { %s976_s28 = smov [#allocation6]   ;;  %s1064_s30 = scalar_lea.sflag [#allocation7], %s197_s25 }
  0x11   : > { %s1284_s27 = scalar_select %p1060_p7, 1, 0 }
  0x12   : > { %s212_s29 = sshll.u32 %s976_s28, 4  ;;  %s1285_s2 = sld [smem:[#allocation14_spill]]  ;;  %s213_s29 = int_to_ptr.vmem [resolvable:$true] %s212_s29 }
  0x13   : > { %p781_p9 = pneg %p1056_p6 }
  0x18   : > { %s779_s7 = scalar_lea.hbm %s1285_s2, 256 }
  0x19   : > { %p780_p8 = scmp.ne.s32.totalorder %s1285_s2, %s779_s7  ;;  %p786_p12 = scmp.lt.u32.totalorder %s779_s7, %s779_s7 }
  0x1a   : > { %p788_p13 = scmp.lt.u32.totalorder %s779_s7, %s1285_s2 }
  0x1b   : > { %p782_p10 = pnand %p781_p9, %p780_p8 }
  0x1c   : > { %p789_p0 = por %p788_p13, %p786_p12 }
  0x1d   : > { %p783_p11 = pneg %p782_p10 }
  0x1f   : > { %p790_p1 = pnand %p789_p0, %p783_p11 }
  0x21   : > { %793 = shalt.err (!%p790_p1)
}
  0x22   : > { %s794_s12 = scalar_lea.vmem %s213_s29, 256  ;;  %s801_s13 = scalar_lea.vmem %s213_s29, 512 }
  0x23   : > { %p795_p2 = scmp.ne.s32.totalorder %s213_s29, %s794_s12  ;;  %p802_p4 = scmp.lt.s32.totalorder %s213_s29, %s213_s29 }
  0x24   : > { %p803_p7 = scmp.lt.s32.totalorder %s801_s13, %s794_s12 }
  0x25   : > { %p797_p3 = pnand %p795_p2, %p781_p9 }
  0x26   : > { %p804_p8 = por %p803_p7, %p802_p4 }
  0x27   : > { %p798_p5 = pneg %p797_p3 }
  0x29   : > { %p805_p10 = pnand %p804_p8, %p798_p5 }
  0x2b   : > { %808 = shalt.err (!%p805_p10)
}
  0x2c   : > { %693 = dma.hbm_to_vmem [thread:$0]  (!%p1056_p6), %s1285_s2, 256, %s213_s29, %s1064_s30  }
  0x2d   : > { %s1090_s25 = sadd.s32 4294967295, %s974_s22   ;;  %s649_s28 = sadd.s32 4294967294, %s974_s22  }
  0x2e   : > { %p101_p4 = scmp.ne.s32.totalorder %s962_s19, %s958_s18  ;;  %p1275_p7 = scmp.eq.s32.totalorder %s1090_s25, 0 }
  0x2f   : > { %s146_s5 = sadd.s32 1, %s954_s17  ;;  %p1286_p11 = scmp.ne.s32.totalorder %s1284_s27, 0 }
  0x30   : > { %p1104_p12 = por %p1275_p7, %p101_p4  ;;  %p156_p13 = scmp.ne.s32.totalorder %s954_s17, %s950_s16 }
  0x31   : > { %s1100_s6 = scalar_select %p1286_p11, %s954_s17, %s146_s5  }
  0x32   : > { %s1287_s7 = scalar_select %p1104_p12, 1, 0 }
  0x33   : > { %p157_p0 = scmp.eq.s32.totalorder %s1090_s25, 1  ;;  %p162_p1 = scmp.ne.s32.totalorder %s950_s16, %s946_s15 }
  0x34   : > { %p163_p2 = scmp.eq.s32.totalorder %s649_s28, 1  ;;  %p650_p3 = scmp.ge.s32.totalorder %s974_s22, 1 }
  0x35   : > { %p1114_p5 = por %p157_p0, %p156_p13  ;;  %p170_p8 = scmp.lt.s32.totalorder %s974_s22, 3 }
  0x36   : > { %p1119_p10 = por %p163_p2, %p162_p1  ;;  %s977_s8 = smov [#allocation3]  }
  0x37   : > { %s1288_s29 = scalar_select %p1114_p5, 1, 0 }
  0x38   : > { %s1289_s18 = scalar_select %p1119_p10, 1, 0 }
  0x39   : > { %p1123_p4 = pnand %p650_p3, %p170_p8  ;;  %s183_s9 = sshll.u32 %s977_s8, 4  ;;  %s1129_s9 = int_to_ptr.vmem [resolvable:$true] %s183_s9 }
  0x3a   : > { %s978_s10 = smov [#allocation8]   ;;  %s809_s24 = scalar_lea.hbm %s1273_s3, 256 }
  0x3b   : > { %s1290_s27 = scalar_select %p1123_p4, 1, 0 }
  0x3c   : > { %s234_s11 = sshll.u32 %s978_s10, 4  ;;  %p686_p11 = pneg %p1123_p4  ;;  %s235_s11 = int_to_ptr.vmem [resolvable:$true] %s234_s11 }
  0x3d   : > { %p810_p0 = scmp.ne.s32.totalorder %s1273_s3, %s809_s24  ;;  %p816_p3 = scmp.lt.u32.totalorder %s809_s24, %s809_s24 }
  0x3e   : > { %p1133_p13 = pnand %p686_p11, %p1275_p7  ;;  %p818_p8 = scmp.lt.u32.totalorder %s809_s24, %s1273_s3 }
  0x3f   : > { %p812_p1 = pnand %p810_p0, %p781_p9 }
  0x40   : > { %s1291_s12 = scalar_select %p1133_p13, 1, 0 }
  0x41   : > { %p813_p2 = pneg %p812_p1  ;;  %p819_p11 = por %p818_p8, %p816_p3 }
  0x43   : > { %p820_p7 = pnand %p819_p11, %p813_p2 }
  0x45   : > { %823 = shalt.err (!%p820_p7)
}
  0x46   : > { %s824_s2 = scalar_lea.vmem %s235_s11, 256  ;;  %s831_s13 = scalar_lea.vmem %s235_s11, 512 }
  0x47   : > { %p825_p10 = scmp.ne.s32.totalorder %s235_s11, %s824_s2  ;;  %p832_p4 = scmp.lt.s32.totalorder %s235_s11, %s235_s11 }
  0x48   : > { %p833_p13 = scmp.lt.s32.totalorder %s831_s13, %s824_s2 }
  0x49   : > { %p827_p5 = pnand %p825_p10, %p781_p9 }
  0x4a   : > { %p834_p0 = por %p833_p13, %p832_p4 }
  0x4b   : > { %p828_p12 = pneg %p827_p5 }
  0x4d   : > { %p835_p1 = pnand %p834_p0, %p828_p12 }
  0x4f   : > { %838 = shalt.err (!%p835_p1)
}
  0x50   : > { %696 = dma.hbm_to_vmem [thread:$0]  (!%p1056_p6), %s1273_s3, 256, %s235_s11, %s1064_s30  }
  0x51   : > { %s839_s8 = scalar_lea.hbm %s1270_s0, 32  ;;  %p1292_p7 = scmp.ne.s32.totalorder %s1291_s12, 0 }
  0x52   : > { %p840_p9 = scmp.ne.s32.totalorder %s1270_s0, %s839_s8  ;;  %p846_p4 = scmp.lt.u32.totalorder %s839_s8, %s1270_s0 }
  0x53   : > { %p841_p5 = pneg %p1292_p7 }
  0x55   : > { %p842_p12 = pnand %p841_p5, %p840_p9 }
  0x57   : > { %p843_p10 = pneg %p842_p12 }
  0x59   : > { %p848_p13 = pnand %p846_p4, %p843_p10 }
  0x5b   : > { %851 = shalt.err (!%p848_p13)
}
  0x5c   : > { %s852_s30 = scalar_lea.vmem %s1129_s9, 32  ;;  %p860_p8 = scmp.lt.s32.totalorder %s1129_s9, %s1129_s9 }
  0x5d   : > { %p853_p6 = scmp.ne.s32.totalorder %s1129_s9, %s852_s30  ;;  %p861_p11 = scmp.lt.s32.totalorder %s852_s30, %s852_s30 }
  0x5f   : > { %p855_p2 = pnand %p853_p6, %p841_p5  ;;  %p862_p0 = por %p861_p11, %p860_p8 }
  0x61   : > { %p856_p3 = pneg %p855_p2 }
  0x63   : > { %p863_p1 = pnand %p862_p0, %p856_p3 }
  0x65   : > { %866 = shalt.err (!%p863_p1)
}
  0x66   : > { %689 = dma.hbm_to_vmem [thread:$0]  (!%p1292_p7), %s1270_s0, 32, %s1129_s9, [#allocation4]  }
  0x67   : > { %p1293_p9 = scmp.ne.s32.totalorder %s1290_s27, 0 }
  0x68   : > { %p1294_p12 = scmp.eq.s32.totalorder (!%p1293_p9), %s1090_s25, 0 }
  0x69   : > { %243 = sbr.rel (%p1293_p9) target bundleno = 384 (0x180), region = 36 }
  0x70   : > { %932 = dma.done.wait (%p1294_p12), [#allocation4], 32   ;;  %p1295_p5 = pmov %p1294_p12 }
  0x71   : > { %s249_s13 = sand.u32 1, %s1090_s25   ;;  %s251_s14 = sand.u32 1, %s962_s19  }
  0x72   : > { %934 = vsyncadd (%p1295_p5), [#allocation4], 4294967264  ;;  %s661_s12 = sshll.u32 %s251_s14, 4  ;;  %s250_s24 = scalar_lea.sflag [#allocation7], %s249_s13 }
  0x73   : > { %s253_s28 = scalar_lea.vmem [#allocation6], %s661_s12  ;;  %p1296_p10 = scmp.ne.s32.totalorder %s1287_s7, 0 }
  0x75   : > { %936 = dma.done.wait (%p1296_p10), %s250_s24, 512  }
  0x76   : > { %938 = vsyncadd (%p1296_p10), %s250_s24, 4294966784  ;;  %v313_v0 = vlaneseq  ;;  %s663_s27 = sshll.u32 %s966_s20, 1  ;;  %v979_v1 = vmov 1983009808   ;;  %s262_s9 = scalar_lea.vmem [#allocation8], %s661_s12  ;;  %v305_v8 = vld [vmem:[%s253_s28] sm:$0xff] }
  0x77   : > { %v324_v2 = vunpack.c.l.s4 %v979_v1  ;;  %v315_v4 = vstv %s663_s27  ;;  %v303_v6 = vld [vmem:[%s262_s9] sm:$0xff]  ;;  %v304_v7 = vld [vmem:[%s262_s9 + $0x8] sm:$0xff]  ;;  %vm471_vm1 = vcmask 1041408   ;;  %vm509_vm2 = vcmask 74752   ;;  %s289_s5 = sand.u32 1, %s950_s16   ;;  %p520_p7 = scmp.eq.s32.totalorder %s966_s20, 0 }
  0x78   : > { %v314_v3 = vshrl.u32 %v313_v0, 7  ;;  %v306_v10 = vld [vmem:[%s253_s28 + $0x8] sm:$0xff]  ;;  %v307_v11 = vsub.f32 %v303_v6, %v305_v8  ;;  %s665_s26 = sshll.u32 %s966_s20, 4  ;;  %s290_s23 = scalar_lea.vmem [#allocation9], %s289_s5 }
  0x79   : > { %v325_v5 = vunpack.c.0.s8 %v324_v2  ;;  %v308_v13 = vsub.f32 %v304_v7, %v306_v10  ;;  %v496_v42 = vld [vmem:[%s1271_s1] sm:$0x3]  ;;  %s542_s11 = sshll.u32 %s290_s23, 4  ;;  %s1217_s24 = scalar_lea.hbm %s1274_s4, %s665_s26  ;;  %s1219_s11 = int_to_ptr.vmem [resolvable:$true] %s542_s11 }
  0x7a   : > { %v316_v9 = vadd.s32 %v315_v4, %v314_v3  ;;  %v309_v14 = vmul.f32 %v307_v11, %v307_v11  ;;  %v497_v48 = vld [vmem:[#allocation3] sm:$0x3]  ;;  %v498_v49 = vsub.f32 0.9, %v496_v42  ;;  %v664_v50 = vadd.f32 -0.1, %v496_v42 }
  0x7b   : > { %v328_v12 = vsub.s32 %v325_v5, %v314_v3  ;;  %v310_v15 = vmul.f32 %v308_v13, %v308_v13  ;;  %v504_v56 = vsub.f32 1.0, %v497_v48  ;;  %s530_s28 = scalar_lea.sflag [#allocation5], %s289_s5  ;;  %s867_s27 = scalar_lea.vmem %s1219_s11, 16 }
  0x7c   : > { %vm317_vm0 = vcmp.lt.s32.totalorder %v316_v9, 2  ;;  %v322_v16 = vcombine.high %v309_v14, %v309_v14  ;;  %v499_v59 = vmax.f32 %v498_v49, 0.0  ;;  %v501_v60 = vmax.f32 %v664_v50, 0.0  ;;  %p868_p4 = scmp.ne.s32.totalorder %s1219_s11, %s867_s27  ;;  %p1297_p13 = scmp.ne.s32.totalorder %s1288_s29, 0 }
  0x7d   : > { %v329_v17 = vrot.slane %v309_v14, %v328_v12  ;;  %v339_v18 = vcombine.high %v310_v15, %v310_v15  ;;  %v346_v19 = vrot.slane %v310_v15, %v328_v12  ;;  %v505_v4 = vmul.f32 0.5, %v504_v56  ;;  %s980_s20 = smov [#allocation9]  }
  0x7e   : > { %v336_v20 = vrot.slane %v322_v16, %v328_v12  ;;  %v502_v3 = vmul.f32 %v499_v59, %v499_v59  ;;  %v506_v5 = vmul.f32 %v501_v60, %v501_v60  ;;  %p869_p6 = pnand %p868_p4, %p1297_p13  ;;  %s871_s9 = sshll.u32 %s980_s20, 4  ;;  %s872_s9 = int_to_ptr.vmem [resolvable:$false] %s871_s9 }
  0x7f   : > { %v337_v21 = vcombine.high %v329_v17, %v329_v17  ;;  %v364_v22 = vsel %vm317_vm0, %v329_v17, 0.0  ;;  %v353_v23 = vrot.slane %v339_v18, %v328_v12  ;;  %v354_v24 = vcombine.high %v346_v19, %v346_v19  ;;  %s873_s25 = scalar_lea.vmem %s872_s9, 32  ;;  %p874_p3 = scmp.lt.s32.totalorder %s1219_s11, %s872_s9 }
  0x80   : > { %v368_v25 = vsel %vm317_vm0, %v346_v19, 0.0  ;;  %v338_v26 = vcombine.high %v336_v20, %v336_v20  ;;  %v366_v28 = vsel %vm317_vm0, %v336_v20, 0.0  ;;  %v503_v11 = vmul.f32 %v502_v3, %v497_v48  ;;  %p870_p2 = pneg %p869_p6  ;;  %p875_p8 = scmp.lt.s32.totalorder %s873_s25, %s867_s27 }
  0x81   : > { %v365_v27 = vsel %vm317_vm0, %v337_v21, 0.0  ;;  %v355_v29 = vcombine.high %v353_v23, %v353_v23  ;;  %v369_v30 = vsel %vm317_vm0, %v354_v24, 0.0  ;;  %v370_v31 = vsel %vm317_vm0, %v353_v23, 0.0 }
  0x82   : > { %v382_v32 = vcombine.low %v364_v22, %v365_v27  ;;  %v367_v33 = vsel %vm317_vm0, %v338_v26, 0.0  ;;  %v399_v34 = vcombine.low %v368_v25, %v369_v30  ;;  %v507_v13 = vmul.f32 %v506_v5, %v505_v4  ;;  %p876_p11 = por %p875_p8, %p874_p3 }
  0x83   : > { %v371_v35 = vsel %vm317_vm0, %v355_v29, 0.0  ;;  %v383_v36 = vcombine.low %v366_v28, %v367_v33 }
  0x84   : > { %v390_v37 = vrot.slane %v382_v32, %v328_v12  ;;  %v400_v38 = vcombine.low %v370_v31, %v371_v35  ;;  %v407_v39 = vrot.slane %v399_v34, %v328_v12  ;;  %v508_v16 = vadd.f32 %v507_v13, %v503_v11  ;;  %p877_p0 = pnand %p876_p11, %p870_p2 }
  0x85   : > { %v397_v40 = vrot.slane %v383_v36, %v328_v12 }
  0x86   : > { %v414_v41 = vrot.slane %v400_v38, %v328_v12  ;;  %v510_v18 = vsel %vm509_vm2, %v508_v16, 0.0 }
  0x87   : > { %v398_v43 = vcombine.low %v390_v37, %v397_v40  ;;  %v670_v44 = vcombine.low %v397_v40, %v397_v40 }
  0x88   : > { %v415_v45 = vcombine.low %v407_v39, %v414_v41  ;;  %v671_v51 = vcombine.low %v414_v41, %v414_v41 }
  0x89   : > { %v436_v46 = vrot.slane %v398_v43, %v328_v12  ;;  %v443_v47 = vrot.slane %v670_v44, %v328_v12 }
  0x8a   : > { %v453_v54 = vrot.slane %v415_v45, %v328_v12  ;;  %v460_v62 = vrot.slane %v671_v51, %v328_v12 }
  0x8b   : > { %v444_v52 = vcombine.high %v436_v46, %v436_v46  ;;  %v445_v53 = vcombine.high %v443_v47, %v443_v47  ;;  %v472_v55 = vsel %vm471_vm1, %v436_v46, 0.0  ;;  %v475_v58 = vsel %vm471_vm1, %v443_v47, 0.0 }
  0x8c   : > { %v461_v63 = vcombine.high %v453_v54, %v453_v54  ;;  %v479_v2 = vsel %vm471_vm1, %v453_v54, 0.0  ;;  %v462_v7 = vcombine.high %v460_v62, %v460_v62  ;;  %v483_v10 = vsel %vm471_vm1, %v460_v62, 0.0 }
  0x8d   : > { %v473_v57 = vsel %vm471_vm1, %v444_v52, 0.0  ;;  %v477_v0 = vsel %vm471_vm1, %v445_v53, 0.0 }
  0x8e   : > { %v474_v61 = vadd.f32 %v473_v57, %v472_v55  ;;  %v481_v8 = vsel %vm471_vm1, %v461_v63, 0.0  ;;  %v485_v12 = vsel %vm471_vm1, %v462_v7, 0.0 }
  0x90   : > { %v476_v1 = vadd.f32 %v475_v58, %v474_v61 }
  0x92   : > { %v478_v6 = vadd.f32 %v477_v0, %v476_v1 }
  0x94   : > { %v480_v9 = vadd.f32 %v479_v2, %v478_v6 }
  0x96   : > { %v482_v14 = vadd.f32 %v481_v8, %v480_v9 }
  0x98   : > { %v484_v15 = vadd.f32 %v483_v10, %v482_v14 }
  0x9a   : > { %v486_v17 = vadd.f32 %v485_v12, %v484_v15 }
  0x9c   : > { %487 = vadd.xlane.f32.xlu0 %v486_v17 }
  0xa0   : > { %511 = vadd.xlane.f32.xlu0 %v510_v18 }
 0x129   : > { %v488_v19 = vpop.xlane.xlu0 %487 }
 0x12a   : > { %v489_v20 = vrot.slane %v488_v19, 4 }
 0x12c   : > { %v490_v21 = vadd.f32 %v489_v20, %v488_v19 }
 0x12d   : > { %v512_v22 = vpop.xlane.xlu0 %511 }
 0x12e   : > { %v491_v23 = vrot.slane %v490_v21, 2  ;;  %v513_v24 = vrot.slane %v512_v22, 4 }
 0x130   : > { %v514_v25 = vadd.f32 %v513_v24, %v512_v22  ;;  %v492_v26 = vadd.f32 %v491_v23, %v490_v21 }
 0x132   : > { %v515_v27 = vrot.slane %v514_v25, 2  ;;  %v493_v28 = vrot.slane %v492_v26, 1 }
 0x134   : > { %v516_v29 = vadd.f32 %v515_v27, %v514_v25  ;;  %v494_v30 = vadd.f32 %v493_v28, %v492_v26 }
 0x136   : > { %672 = vpush %v494_v30  ;;  %v517_v31 = vrot.slane %v516_v29, 1 }
 0x138   : > { %v518_v32 = vadd.f32 %v517_v31, %v516_v29 }
 0x13a   : > { %674 = vpush %v518_v32 }
 0x167   : > { %s673_s8 = spop %672 }
 0x168   : > { %s522_s10 = smul.f32 0.0005, %s673_s8 }
 0x16b   : > { %s675_s2 = spop %674 }
 0x16c   : > { %s1310_s2 = smov (!%p520_p7, %s675_s2), 0.0 }
 0x16d   : > { %s523_s30 = sadd.f32 %s522_s10, %s1310_s2 }
 0x16f   : > { %s526_s13 = smul.f32 0.5, %s523_s30 }
 0x171   : > { %v527_v33 = vstv %s526_s13 }
 0x172   : > { %528 = vst [vmem:[%s290_s23] sm:$0x1] %v527_v33 }
 0x173   : > { %880 = shalt.err (!%p877_p0)
}
 0x174   : > { %s881_s7 = scalar_lea.hbm %s1217_s24, 16  ;;  %s885_s10 = scalar_lea.hbm %s1274_s4, 32 }
 0x175   : > { %p882_p1 = scmp.ne.s32.totalorder %s1217_s24, %s881_s7  ;;  %p886_p5 = scmp.lt.u32.totalorder %s1217_s24, %s1274_s4 }
 0x176   : > { %p887_p10 = scmp.lt.u32.totalorder %s885_s10, %s881_s7  ;;  %p889_p4 = scmp.lt.u32.totalorder %s881_s7, %s1217_s24 }
 0x177   : > { %p883_p9 = pnand %p882_p1, %p1297_p13 }
 0x178   : > { %p888_p7 = por %p887_p10, %p886_p5 }
 0x179   : > { %p884_p12 = pneg %p883_p9 }
 0x17a   : > { %p890_p6 = por %p889_p4, %p888_p7 }
 0x17c   : > { %p891_p2 = pnand %p890_p6, %p884_p12 }
 0x17e   : > { %894 = shalt.err (!%p891_p2)
}
 0x17f   : > { %684 = dma.vmem_to_hbm [thread:$0]  (%p1297_p13), %s1219_s11, 16, %s1217_s24, %s530_s28  }
 0x180 PF: > { %s554_s30 = sand.u32 1, %s946_s15   ;;  %p1298_p3 = scmp.ne.s32.totalorder %s1289_s18, 0 }
 0x181   : > { %p1299_p8 = scmp.ge.s32.totalorder %s974_s22, 2  ;;  %s555_s23 = scalar_lea.sflag [#allocation5], %s554_s30 }
 0x183   : > { %p698_p11 = pnand %p1299_p8, %p1298_p3 }
 0x185   : > { %940 = dma.done.wait (!%p698_p11), %s555_s23, 16  }
 0x186   : > { %942 = vsyncadd (!%p698_p11), %s555_s23, 4294967280  ;;  %s21_s22 = sadd.s32 1, %s974_s22   ;;  %s1300_s29 = sld [smem:[#allocation13_spill]] }
 0x187   : > { %p18_p0 = scmp.ge.s32.totalorder %s21_s22, 4   ;;  %s1301_s15 = smov %s950_s16 }
 0x188   : > { %s1302_s16 = smov %s954_s17  ;;  %s1303_s17 = smov %s1100_s6 }
 0x189   : > { %s1304_s18 = smov %s962_s19  ;;  %s1260_s19 = smov 0  }
 0x18a   : > { %s1305_s20 = smov %s970_s21  ;;  %20 = sbr.rel (!%p18_p0) target bundleno = 10 (0xa), region = 105 }
 0x18c   : > { %s1306_s21 = smov %s1300_s29 }
 0x191   :  { %559 = vsyncpa [#allocation4], 1 }
 0x192   :  { %561 = vsyncpa [#allocation4 + $0x1], 1 }
 0x193   :  { %562 = vsyncpa [#allocation7], 1 }
 0x194   :  { %564 = vsyncpa [#allocation7 + $0x1], 1 }
 0x195   :  { %565 = vsyncpa [#allocation5], 1 }
 0x196   :  { %567 = vsyncpa [#allocation5 + $0x1], 1 }

</bundles_post_ra>
